<compile_context>
chip_gen: v6e
topology: v6e:2x2x1
jax: 0.10.0
libtpu: 0.0.40
codegen_flags: <defaults>
</compile_context>

<pallas_src>
import functools

import jax
import jax.numpy as jnp
from jax.experimental import pallas as pl
from jax.experimental.pallas import tpu as pltpu


def _round_up(x, m):
    return (x + m - 1) // m * m


def critic_kernel(x_ref, w1_ref, b1_ref, w2_ref, b2_ref, wq_ref, bq_ref, q_ref):
    # fc1: single bf16 MXU matmul over the fused [state | action] input, fp32 acc.
    h1 = jnp.dot(x_ref[...], w1_ref[...], preferred_element_type=jnp.float32)
    # Bias + ReLU in fp32 on the VPU; bf16 cast fused so only the bf16 copy of h1
    # is materialized (feeds the next MXU matmul directly).
    h1 = jnp.maximum(h1 + b1_ref[...], 0.0).astype(jnp.bfloat16)

    # fc2: bf16 MXU matmul, fp32 accumulation; bias + ReLU stay fp32 (consumed below).
    h2 = jnp.dot(h1, w2_ref[...], preferred_element_type=jnp.float32)
    h2 = jnp.maximum(h2 + b2_ref[...], 0.0)

    # q head (out_features = 1): VPU elementwise multiply + XLU lane reduction
    # instead of an N=1 MXU matmul that would occupy 1/256 of the output lanes.
    q_ref[...] = jnp.sum(h2 * wq_ref[...], axis=-1, keepdims=True) + bq_ref[0, 0]


def _default_block_b(batch_size):
    """Per-generation batch-tile heuristic (perf review):
       * single-TC v5e / v6e: large tiles (512) amortize per-grid-step overhead
         (weights + activations stay far below VMEM limits).
       * dual-TC parts (v7x, v4/v5p megacore): ensure the grid has >= 2 steps so
         dimension_semantics=("parallel",) actually spreads tiles over both cores.
    Heuristic only affects performance, never correctness."""
    try:
        kind = jax.devices()[0].device_kind.lower()
    except Exception:  # pragma: no cover - defensive, perf-only heuristic
        kind = ""
    dual_tc = any(tag in kind for tag in ("v7", "7x", "v4", "v5p"))
    if dual_tc and batch_size > 32:
        return max(16, _round_up((batch_size + 1) // 2, 16))
    return 512


@functools.partial(jax.jit, static_argnames=("block_b",))
def _critic_forward_impl(state, action, params, *, block_b):
    w1, b1, w2, b2, wq, bq = params

    # One fused pass over the batch: bf16 cast + concat (replaces the previous
    # pad + split-weight path; no output slice either).
    x = jnp.concatenate(
        [state.astype(jnp.bfloat16), action.astype(jnp.bfloat16)], axis=1)

    B, K = x.shape
    fc1 = w1.shape[1]
    fc2 = w2.shape[1]

    block_b = _round_up(block_b, 16)  # bf16 native sublane tile is (16, 128)
    # Single tile covering the whole batch -> full-extent block (always legal,
    # no wrapper pad). Otherwise a multiple-of-16 tile; Pallas handles the ragged
    # last block (rows are independent, pad rows never written back).
    tb = B if B <= block_b else block_b
    grid = (pl.cdiv(B, tb),)

    q = pl.pallas_call(
        critic_kernel,
        out_shape=jax.ShapeDtypeStruct((B, 1), jnp.float32),
        grid=grid,
        in_specs=[
            pl.BlockSpec((tb, K), lambda i: (i, 0)),        # [state|action] tile (bf16)
            # Weights / biases: constant block index -> fetched once, VMEM-resident
            # across all grid steps (no per-step re-DMA).
            pl.BlockSpec((K, fc1), lambda i: (0, 0)),       # W1 (bf16)
            pl.BlockSpec((1, fc1), lambda i: (0, 0)),       # b1 (fp32)
            pl.BlockSpec((fc1, fc2), lambda i: (0, 0)),     # W2 (bf16)
            pl.BlockSpec((1, fc2), lambda i: (0, 0)),       # b2 (fp32)
            pl.BlockSpec((1, fc2), lambda i: (0, 0)),       # wq row vector (fp32)
            pl.BlockSpec(memory_space=pltpu.MemorySpace.SMEM),  # bq scalar (1,1) fp32
        ],
        out_specs=pl.BlockSpec((tb, 1), lambda i: (i, 0)),
        compiler_params=pltpu.CompilerParams(
            dimension_semantics=("parallel",)),
    )(x, w1, b1, w2, b2, wq, bq)
    return q


def critic_forward(state, action, params, *, block_b=None):
    """state: [B, input_dims] f32, action: [B, n_actions] f32 -> q: [B, 1] f32."""
    if block_b is None:
        block_b = _default_block_b(state.shape[0])
    return _critic_forward_impl(state, action, params, block_b=int(block_b))


def prepare_params(w1, b1, w2, b2, wq, bq):
    """Cast PyTorch-layout params (weights stored as [in, out]) into kernel layout."""
    return (
        w1.astype(jnp.bfloat16),                 # (S+A, fc1)
        b1.reshape(1, -1).astype(jnp.float32),   # (1, fc1)
        w2.astype(jnp.bfloat16),                 # (fc1, fc2)
        b2.reshape(1, -1).astype(jnp.float32),   # (1, fc2)
        wq.reshape(1, -1).astype(jnp.float32),   # (1, fc2) row vector for the q head
        bq.reshape(1, 1).astype(jnp.float32),    # (1, 1) SMEM scalar
    )


def init_linear(key, fan_in, fan_out):
    """Deterministic init mimicking torch.nn.Linear default U[-1/sqrt(fan_in), 1/sqrt(fan_in)]."""
    kw, kb = jax.random.split(key)
    bound = 1.0 / jnp.sqrt(jnp.float32(fan_in))
    w = jax.random.uniform(kw, (fan_in, fan_out), jnp.float32, -bound, bound)
    b = jax.random.uniform(kb, (fan_out,), jnp.float32, -bound, bound)
    return w, b


if __name__ == "__main__":
    # Small shapes consistent with the module: input_dims=[16], n_actions=4, fc dims 256.
    B = 8
    input_dims = 16
    n_actions = 4
    fc1_dims = 256
    fc2_dims = 256

    key = jax.random.PRNGKey(0)
    k_state, k_action, k1, k2, k3 = jax.random.split(key, 5)

    state = jax.random.normal(k_state, (B, input_dims), jnp.float32)
    action = jax.random.normal(k_action, (B, n_actions), jnp.float32)

    w1, b1 = init_linear(k1, input_dims + n_actions, fc1_dims)
    w2, b2 = init_linear(k2, fc1_dims, fc2_dims)
    wq, bq = init_linear(k3, fc2_dims, 1)

    params = prepare_params(w1, b1, w2, b2, wq, bq)

    q = critic_forward(state, action, params)
    q = jax.block_until_ready(q)
    assert q.shape == (B, 1)

    # Reference with the same bf16-weight / fp32-accumulate numerics as the kernel.
    def ref_same_numerics(st, ac):
        w1b, b1p, w2b, b2p, wqp, bqp = params
        xb = jnp.concatenate([st.astype(jnp.bfloat16), ac.astype(jnp.bfloat16)], axis=1)
        h1 = jnp.dot(xb, w1b, preferred_element_type=jnp.float32)
        h1 = jnp.maximum(h1 + b1p, 0.0).astype(jnp.bfloat16)
        h2 = jnp.dot(h1, w2b, preferred_element_type=jnp.float32)
        h2 = jnp.maximum(h2 + b2p, 0.0)
        return jnp.sum(h2 * wqp, axis=-1, keepdims=True) + bqp[0, 0]

    assert jnp.allclose(q, ref_same_numerics(state, action), atol=2e-3, rtol=2e-3)

    # Loose sanity check against the full-fp32 PyTorch-equivalent math.
    x = jnp.concatenate([state, action], axis=1)
    h1f = jnp.maximum(x @ w1 + b1, 0.0)
    h2f = jnp.maximum(h1f @ w2 + b2, 0.0)
    qf = h2f @ wq + bq
    assert jnp.allclose(q, qf, atol=5e-2, rtol=5e-2)

    # Second check: ragged multi-tile grid (B not a multiple of the tile) exercises
    # the no-pad path, partial last block, and VMEM-resident weights across steps.
    B2 = 40
    st2 = jax.random.normal(jax.random.PRNGKey(1), (B2, input_dims), jnp.float32)
    ac2 = jax.random.normal(jax.random.PRNGKey(2), (B2, n_actions), jnp.float32)
    q2 = jax.block_until_ready(critic_forward(st2, ac2, params, block_b=16))
    assert q2.shape == (B2, 1)
    assert jnp.allclose(q2, ref_same_numerics(st2, ac2), atol=2e-3, rtol=2e-3)

    print("KERNEL_OK")
</pallas_src>

<mosaic_0001>
module attributes {stable_mosaic.version = 11 : i64} {
  func.func @critic_kernel(%arg0: i32, %arg1: memref<8x20xbf16, #tpu.memory_space<vmem>>, %arg2: memref<20x256xbf16, #tpu.memory_space<vmem>>, %arg3: memref<1x256xf32, #tpu.memory_space<vmem>>, %arg4: memref<256x256xbf16, #tpu.memory_space<vmem>>, %arg5: memref<1x256xf32, #tpu.memory_space<vmem>>, %arg6: memref<1x256xf32, #tpu.memory_space<vmem>>, %arg7: memref<1x1xf32, #tpu.memory_space<smem>>, %arg8: memref<8x1xf32, #tpu.memory_space<vmem>>) attributes {dimension_semantics = [#tpu.dimension_semantics<parallel>], iteration_bounds = array<i64: 1>, scalar_prefetch = 0 : i64, scratch_operands = 0 : i64, tpu.core_type = #tpu.core_type<tc>, window_params = [{transform_indices = @transform_0, window_bounds = array<i64: 8, 20>}, {pipeline_mode = #tpu.pipeline_mode<synchronous>, transform_indices = @transform_1, window_bounds = array<i64: 20, 256>}, {pipeline_mode = #tpu.pipeline_mode<synchronous>, transform_indices = @transform_2, window_bounds = array<i64: 1, 256>}, {pipeline_mode = #tpu.pipeline_mode<synchronous>, transform_indices = @transform_3, window_bounds = array<i64: 256, 256>}, {pipeline_mode = #tpu.pipeline_mode<synchronous>, transform_indices = @transform_4, window_bounds = array<i64: 1, 256>}, {pipeline_mode = #tpu.pipeline_mode<synchronous>, transform_indices = @transform_5, window_bounds = array<i64: 1, 256>}, {transform_indices = @transform_6, window_bounds = array<i64: 1, 1>}, {transform_indices = @transform_7, window_bounds = array<i64: 8, 1>}]} {
    %c0 = arith.constant 0 : index
    %c0_0 = arith.constant 0 : index
    %0 = vector.load %arg1[%c0, %c0_0] : memref<8x20xbf16, #tpu.memory_space<vmem>>, vector<8x20xbf16>
    %c0_1 = arith.constant 0 : index
    %c0_2 = arith.constant 0 : index
    %1 = vector.load %arg2[%c0_1, %c0_2] : memref<20x256xbf16, #tpu.memory_space<vmem>>, vector<20x256xbf16>
    %cst = arith.constant dense<0.000000e+00> : vector<8x256xf32>
    %2 = tpu.matmul %0, %1, %cst {dimension_numbers = #tpu.dot_dimension_numbers<[1], [0], [0], [1], [0, 0, 1, 1], [], []>} : vector<8x20xbf16>, vector<20x256xbf16>, vector<8x256xf32> -> vector<8x256xf32>
    %c0_3 = arith.constant 0 : index
    %c0_4 = arith.constant 0 : index
    %3 = vector.load %arg3[%c0_3, %c0_4] : memref<1x256xf32, #tpu.memory_space<vmem>>, vector<1x256xf32>
    %4 = vector.broadcast %3 : vector<1x256xf32> to vector<8x256xf32>
    %5 = arith.addf %2, %4 : vector<8x256xf32>
    %cst_5 = arith.constant 0.000000e+00 : f32
    %6 = vector.broadcast %cst_5 : f32 to vector<8x256xf32>
    %7 = arith.maximumf %5, %6 : vector<8x256xf32>
    %8 = arith.truncf %7 : vector<8x256xf32> to vector<8x256xbf16>
    %c0_6 = arith.constant 0 : index
    %c0_7 = arith.constant 0 : index
    %9 = vector.load %arg4[%c0_6, %c0_7] : memref<256x256xbf16, #tpu.memory_space<vmem>>, vector<256x256xbf16>
    %cst_8 = arith.constant dense<0.000000e+00> : vector<8x256xf32>
    %10 = tpu.matmul %8, %9, %cst_8 {dimension_numbers = #tpu.dot_dimension_numbers<[1], [0], [0], [1], [0, 0, 1, 1], [], []>} : vector<8x256xbf16>, vector<256x256xbf16>, vector<8x256xf32> -> vector<8x256xf32>
    %c0_9 = arith.constant 0 : index
    %c0_10 = arith.constant 0 : index
    %11 = vector.load %arg5[%c0_9, %c0_10] : memref<1x256xf32, #tpu.memory_space<vmem>>, vector<1x256xf32>
    %12 = vector.broadcast %11 : vector<1x256xf32> to vector<8x256xf32>
    %13 = arith.addf %10, %12 : vector<8x256xf32>
    %cst_11 = arith.constant 0.000000e+00 : f32
    %14 = vector.broadcast %cst_11 : f32 to vector<8x256xf32>
    %15 = arith.maximumf %13, %14 : vector<8x256xf32>
    %c0_12 = arith.constant 0 : index
    %c0_13 = arith.constant 0 : index
    %16 = vector.load %arg6[%c0_12, %c0_13] : memref<1x256xf32, #tpu.memory_space<vmem>>, vector<1x256xf32>
    %17 = vector.broadcast %16 : vector<1x256xf32> to vector<8x256xf32>
    %18 = arith.mulf %15, %17 : vector<8x256xf32>
    %cst_14 = arith.constant dense<0.000000e+00> : vector<8xf32>
    %19 = vector.multi_reduction <add>, %18, %cst_14 [1] : vector<8x256xf32> to vector<8xf32>
    %20 = vector.shape_cast %19 : vector<8xf32> to vector<8x1xf32>
    %c0_15 = arith.constant 0 : index
    %c0_16 = arith.constant 0 : index
    %21 = memref.load %arg7[%c0_15, %c0_16] : memref<1x1xf32, #tpu.memory_space<smem>>
    %22 = vector.broadcast %21 : f32 to vector<8x1xf32>
    %23 = arith.addf %20, %22 : vector<8x1xf32>
    %c0_17 = arith.constant 0 : index
    %c0_18 = arith.constant 0 : index
    %24 = vector.load %arg8[%c0_17, %c0_18] : memref<8x1xf32, #tpu.memory_space<vmem>>, vector<8x1xf32>
    tpu.vector_store %arg8[%c0_17, %c0_18], %23 {strides = array<i32>} : memref<8x1xf32, #tpu.memory_space<vmem>>, vector<8x1xf32>,
    return
  }
  func.func @transform_0(%arg0: i32) -> (i32, i32) {
    %c0_i32 = arith.constant 0 : i32
    %c0_i32_0 = arith.constant 0 : i32
    return %arg0, %c0_i32 : i32, i32
  }
  func.func @transform_1(%arg0: i32) -> (i32, i32) {
    %c0_i32 = arith.constant 0 : i32
    %c0_i32_0 = arith.constant 0 : i32
    %c0_i32_1 = arith.constant 0 : i32
    return %c0_i32, %c0_i32_0 : i32, i32
  }
  func.func @transform_2(%arg0: i32) -> (i32, i32) {
    %c0_i32 = arith.constant 0 : i32
    %c0_i32_0 = arith.constant 0 : i32
    %c0_i32_1 = arith.constant 0 : i32
    return %c0_i32, %c0_i32_0 : i32, i32
  }
  func.func @transform_3(%arg0: i32) -> (i32, i32) {
    %c0_i32 = arith.constant 0 : i32
    %c0_i32_0 = arith.constant 0 : i32
    %c0_i32_1 = arith.constant 0 : i32
    return %c0_i32, %c0_i32_0 : i32, i32
  }
  func.func @transform_4(%arg0: i32) -> (i32, i32) {
    %c0_i32 = arith.constant 0 : i32
    %c0_i32_0 = arith.constant 0 : i32
    %c0_i32_1 = arith.constant 0 : i32
    return %c0_i32, %c0_i32_0 : i32, i32
  }
  func.func @transform_5(%arg0: i32) -> (i32, i32) {
    %c0_i32 = arith.constant 0 : i32
    %c0_i32_0 = arith.constant 0 : i32
    %c0_i32_1 = arith.constant 0 : i32
    return %c0_i32, %c0_i32_0 : i32, i32
  }
  func.func @transform_6(%arg0: i32) -> (i32, i32) {
    %c0_i32 = arith.constant 0 : i32
    %c0_i32_0 = arith.constant 0 : i32
    %c0_i32_1 = arith.constant 0 : i32
    return %c0_i32, %c0_i32_0 : i32, i32
  }
  func.func @transform_7(%arg0: i32) -> (i32, i32) {
    %c0_i32 = arith.constant 0 : i32
    %c0_i32_0 = arith.constant 0 : i32
    return %arg0, %c0_i32 : i32, i32
  }
}

</mosaic_0001>

<bundles_post_ra>
// kernel: _critic_forward_impl.1
= control target key start
LH: loop header
LB: loop body
LE: loop exit
PB: predicated region body
PF: predicated region fallthrough
CT: control target
= control target key end

     0   :  { %13 = vsyncpa [#allocation4], 0  ;;  %s520_s24 = smov [#allocation3]   ;;  %s594_s0 = inlined_call_operand.vmem [shape: bf16[8,20], index: 0, kind: input, shape index: {}]   ;;  %s595_s1 = inlined_call_operand.vmem [shape: bf16[20,256], index: 1, kind: input, shape index: {}]   ;;  %s596_s2 = inlined_call_operand.vmem [shape: f32[1,256], index: 2, kind: input, shape index: {}]   ;;  %s597_s3 = inlined_call_operand.hbm [shape: bf16[256,256], index: 3, kind: input, shape index: {}]   ;;  %s598_s4 = inlined_call_operand.vmem [shape: f32[1,256], index: 4, kind: input, shape index: {}]   ;;  %s599_s5 = inlined_call_operand.vmem [shape: f32[1,256], index: 5, kind: input, shape index: {}]   ;;  %s600_s6 = inlined_call_operand.<no memory space> [shape: f32[1,1], index: 6, kind: input, shape index: {}]   ;;  %s601_s7 = inlined_call_operand.vmem [shape: f32[8,1], index: 7, kind: output, shape index: {}]  }
   0x1   :  { %s25_s25 = sshll.u32 %s520_s24, 4  ;;  %s26_s25 = int_to_ptr.vmem [resolvable:$true] %s25_s25 }
   0x2   :  { %s506_s26 = scalar_lea.vmem %s26_s25, 4096  ;;  %p511_p1 = scmp.lt.s32.totalorder %s26_s25, %s26_s25 }
   0x3   :  { %p507_p0 = scmp.ne.s32.totalorder %s26_s25, %s506_s26  ;;  %p512_p2 = scmp.lt.s32.totalorder %s506_s26, %s506_s26 }
   0x5   :  { %p513_p3 = por %p512_p2, %p511_p1 }
   0x7   :  { %p514_p4 = pnand %p513_p3, %p507_p0 }
   0x9   :  { %517 = shalt.err (!%p514_p4)
}
   0xa   :  { %s521_s27 = smov 128   ;;  %s522_s28 = smov 8  }
   0xb   :  { %31 = dma.hbm_to_vmem [thread:$0]  %s597_s3, 4096, %s26_s25, [#allocation4], %s521_s27, %s521_s27, %s522_s28  }
   0xc   :  { %518 = dma.done.wait [#allocation4], 4096  }
   0xd   :  { %519 = vsyncadd [#allocation4], 4294963200  ;;  %v523_v0 = vmov 0   ;;  %v45_v1 = vld [vmem:[%s595_s1 + $0x10] sm:$0x33]  ;;  %vm77_vm0 = vcmask 1041408   ;;  %v48_v40 = vlaneseq }
   0xe   :  { %116 = vmatprep.mubr.bf16.mxu0 %v523_v0  ;;  %v406_v2 = vcombine.high %v45_v1, %v45_v1  ;;  %v405_v3 = vcombine.low %v45_v1, %v45_v1  ;;  %v447_v4 = vld [vmem:[%s595_s1 + $0x4] ss:$8 sps:$4 sm:$0xff]   ;;  %v450_v5 = vld [vmem:[#allocation3 + $0x74] ss:$8 sps:$4 sm:$0xff]   ;;  %v452_v7 = vld [vmem:[#allocation3 + $0x70] ss:$8 sps:$4 sm:$0xff]  }
   0xf   :  { %v449_v8 = vld [vmem:[%s595_s1] ss:$8 sps:$4 sm:$0xff]   ;;  %333 = vmatprep.subr.bf16.mxu1 %v450_v5  ;;  %v453_v9 = vld [vmem:[#allocation3 + $0x64] ss:$8 sps:$4 sm:$0xff]   ;;  %v456_v11 = vld [vmem:[#allocation3 + $0x54] ss:$8 sps:$4 sm:$0xff]  }
  0x10   :  { %407 = vmatprep.subr.msk.bf16.mxu0 %vm77_vm0, %v406_v2  ;;  %v79_v6 = vsel %vm77_vm0, %v405_v3, 0  ;;  %334 = vmatpush1.bf16.msra.mxu1 %v452_v7  ;;  %v455_v10 = vld [vmem:[#allocation3 + $0x60] ss:$8 sps:$4 sm:$0xff]   ;;  %vm73_vm1 = vcmask 162816   ;;  %v458_v13 = vld [vmem:[#allocation3 + $0x50] ss:$8 sps:$4 sm:$0xff]  }
  0x11   :  { %97 = vmatpush1.bf16.msra.mxu0 %v79_v6  ;;  %335 = vmatprep.subr.bf16.mxu1 %v453_v9  ;;  %v42_v12 = vld [vmem:[%s594_s0] sm:$0xf]  ;;  %v459_v14 = vld [vmem:[#allocation3 + $0x44] ss:$8 sps:$4 sm:$0xff]   ;;  %v462_v16 = vld [vmem:[#allocation3 + $0x34] ss:$8 sps:$4 sm:$0xff]  }
  0x12   :  { %98 = vmatprep.subr.bf16.mxu0 %v447_v4  ;;  %v461_v15 = vld [vmem:[#allocation3 + $0x40] ss:$8 sps:$4 sm:$0xff]   ;;  %v464_v17 = vld [vmem:[#allocation3 + $0x30] ss:$8 sps:$4 sm:$0xff]   ;;  %v465_v18 = vld [vmem:[#allocation3 + $0x24] ss:$8 sps:$4 sm:$0xff]  }
  0x13   :  { %v467_v19 = vld [vmem:[#allocation3 + $0x20] ss:$8 sps:$4 sm:$0xff]   ;;  %v468_v20 = vld [vmem:[#allocation3 + $0x14] ss:$8 sps:$4 sm:$0xff]   ;;  %v470_v21 = vld [vmem:[#allocation3 + $0x10] ss:$8 sps:$4 sm:$0xff]  }
  0x14   :  { %336 = vmatpush1.bf16.msra.mxu1 %v455_v10  ;;  %v471_v22 = vld [vmem:[#allocation3 + $0x4] ss:$8 sps:$4 sm:$0xff]   ;;  %v473_v23 = vld [vmem:[#allocation3] ss:$8 sps:$4 sm:$0xff]   ;;  %v474_v24 = vld [vmem:[#allocation3 + $0xf4] ss:$8 sps:$4 sm:$0xff]   ;;  %v394_v10 = vstv %s600_s6 }
  0x15   :  { %99 = vmatpush1.bf16.msra.mxu0 %v449_v8  ;;  %337 = vmatprep.subr.bf16.mxu1 %v456_v11  ;;  %v476_v25 = vld [vmem:[#allocation3 + $0xf0] ss:$8 sps:$4 sm:$0xff]   ;;  %v477_v26 = vld [vmem:[#allocation3 + $0xe4] ss:$8 sps:$4 sm:$0xff]   ;;  %v479_v27 = vld [vmem:[#allocation3 + $0xe0] ss:$8 sps:$4 sm:$0xff]  }
  0x16   :  { %v480_v28 = vld [vmem:[#allocation3 + $0xd4] ss:$8 sps:$4 sm:$0xff]   ;;  %v482_v29 = vld [vmem:[#allocation3 + $0xd0] ss:$8 sps:$4 sm:$0xff]   ;;  %v483_v30 = vld [vmem:[#allocation3 + $0xc4] ss:$8 sps:$4 sm:$0xff]  }
  0x17   :  { %v485_v31 = vld [vmem:[#allocation3 + $0xc0] ss:$8 sps:$4 sm:$0xff]   ;;  %v486_v32 = vld [vmem:[#allocation3 + $0xb4] ss:$8 sps:$4 sm:$0xff]   ;;  %v488_v33 = vld [vmem:[#allocation3 + $0xb0] ss:$8 sps:$4 sm:$0xff]  }
  0x18   :  { %408 = vmatmul.mubr.msk.bf16.vlgmr.msra.gmra.mxu0 %vm73_vm1, %v42_v12  ;;  %338 = vmatpush1.bf16.msra.mxu1 %v458_v13  ;;  %v489_v34 = vld [vmem:[#allocation3 + $0xa4] ss:$8 sps:$4 sm:$0xff]   ;;  %v491_v35 = vld [vmem:[#allocation3 + $0xa0] ss:$8 sps:$4 sm:$0xff]   ;;  %v492_v36 = vld [vmem:[#allocation3 + $0x94] ss:$8 sps:$4 sm:$0xff]  }
  0x19   :  { %339 = vmatprep.subr.bf16.mxu1 %v459_v14  ;;  %v494_v37 = vld [vmem:[#allocation3 + $0x90] ss:$8 sps:$4 sm:$0xff]   ;;  %v495_v38 = vld [vmem:[#allocation3 + $0x84] ss:$8 sps:$4 sm:$0xff]   ;;  %v497_v39 = vld [vmem:[#allocation3 + $0x80] ss:$8 sps:$4 sm:$0xff]  }
  0x1a   :  { %v49_v41 = vshrl.u32 %v48_v40, 7  ;;  %v46_v43 = vld [vmem:[%s596_s2] sm:$0x3]  ;;  %vm396_vm2 = vcmask 7168  }
  0x1b   :  { %v161_v57 = vld [vmem:[%s598_s4] sm:$0x3] }
  0x1c   :  { %340 = vmatpush1.bf16.msra.mxu1 %v461_v15  ;;  %v50_v42 = vsub.s32 0, %v49_v41  ;;  %v54_v44 = vsub.s32 1, %v49_v41  ;;  %v376_v61 = vld [vmem:[%s599_s5] sm:$0x3] }
  0x1d   :  { %341 = vmatprep.subr.bf16.mxu1 %v462_v16 }
  0x1e   :  { %v51_v45 = vrot.slane %v46_v43, %v50_v42  ;;  %v55_v46 = vrot.slane %v46_v43, %v54_v44  ;;  %v166_v58 = vrot.slane %v161_v57, %v50_v42  ;;  %v170_v59 = vrot.slane %v161_v57, %v54_v44 }
  0x1f   :  { %v381_v2 = vrot.slane %v376_v61, %v50_v42  ;;  %v385_v3 = vrot.slane %v376_v61, %v54_v44 }
  0x20   :  { %342 = vmatpush1.bf16.msra.mxu1 %v464_v17 }
  0x21   :  { %343 = vmatprep.subr.bf16.mxu1 %v465_v18 }
  0x24   :  { %344 = vmatpush1.bf16.msra.mxu1 %v467_v19 }
  0x25   :  { %345 = vmatprep.subr.bf16.mxu1 %v468_v20 }
  0x28   :  { %346 = vmatpush1.bf16.msra.mxu1 %v470_v21 }
  0x29   :  { %347 = vmatprep.subr.bf16.mxu1 %v471_v22 }
  0x2c   :  { %348 = vmatpush1.bf16.msra.mxu1 %v473_v23 }
  0x2d   :  { %349 = vmatprep.subr.bf16.mxu1 %v474_v24 }
  0x30   :  { %350 = vmatpush2.bf16.msra.mxu1 %v476_v25 }
  0x31   :  { %351 = vmatprep.subr.bf16.mxu1 %v477_v26 }
  0x34   :  { %352 = vmatpush2.bf16.msra.mxu1 %v479_v27 }
  0x35   :  { %353 = vmatprep.subr.bf16.mxu1 %v480_v28 }
  0x38   :  { %354 = vmatpush2.bf16.msra.mxu1 %v482_v29 }
  0x39   :  { %355 = vmatprep.subr.bf16.mxu1 %v483_v30 }
  0x3c   :  { %356 = vmatpush2.bf16.msra.mxu1 %v485_v31 }
  0x3d   :  { %357 = vmatprep.subr.bf16.mxu1 %v486_v32 }
  0x40   :  { %358 = vmatpush2.bf16.msra.mxu1 %v488_v33 }
  0x41   :  { %359 = vmatprep.subr.bf16.mxu1 %v489_v34 }
  0x44   :  { %360 = vmatpush2.bf16.msra.mxu1 %v491_v35 }
  0x45   :  { %361 = vmatprep.subr.bf16.mxu1 %v492_v36 }
  0x48   :  { %362 = vmatpush2.bf16.msra.mxu1 %v494_v37 }
  0x49   :  { %363 = vmatprep.subr.bf16.mxu1 %v495_v38 }
  0x4c   :  { %364 = vmatpush2.bf16.msra.mxu1 %v497_v39 }
  0xd8   :  { %v118_v47 = vpop.f32.mrf.mxu0 }
  0xd9   :  { %v119_v48 = vadd.f32 %v118_v47, %v51_v45 }
  0xda   :  { %v120_v49 = vpop.f32.mrf.mxu0 }
  0xdb   :  { %v121_v50 = vadd.f32 %v120_v49, %v55_v46  ;;  %v125_v51 = vmax.f32 %v119_v48, 0.0 }
  0xdc   :  { %v122_v52 = vpop.f32.mrf.mxu0 }
  0xdd   :  { %v126_v53 = vmax.f32 %v121_v50, 0.0  ;;  %v127_v56 = vpack.c.bf16 %v125_v51, %v125_v51 }
  0xde   :  { %v123_v54 = vpop.f32.mrf.mxu0 }
  0xdf   :  { %v128_v55 = vpack.c.bf16 %v126_v53, %v126_v53 }
  0xe1   :  { %365 = vmatprep.mubr.bf16.mxu1 %v128_v55 }
  0xe2   :  { %366 = vmatmul.mubr.bf16.vlgmr.msra.gmra.mxu1 %v127_v56 }
 0x1a2   :  { %v367_v60 = vpop.f32.mrf.mxu1 }
 0x1a3   :  { %v368_v62 = vadd.f32 %v367_v60, %v166_v58 }
 0x1a4   :  { %v369_v63 = vpop.f32.mrf.mxu1 }
 0x1a5   :  { %v374_v0 = vmax.f32 %v368_v62, 0.0  ;;  %v370_v1 = vadd.f32 %v369_v63, %v170_v59 }
 0x1a6   :  { %v371_v4 = vpop.f32.mrf.mxu1 }
 0x1a7   :  { %v375_v5 = vmax.f32 %v370_v1, 0.0  ;;  %v388_v7 = vmul.f32 %v381_v2, %v374_v0 }
 0x1a8   :  { %v372_v6 = vpop.f32.mrf.mxu1 }
 0x1a9   :  { %v389_v8 = vmul.f32 %v385_v3, %v375_v5 }
 0x1ab   :  { %v390_v9 = vadd.f32 %v389_v8, %v388_v7 }
 0x1ad   :  { %391 = vadd.xlane.f32.xlu0 %v390_v9 }
 0x236   :  { %v392_v11 = vpop.xlane.xlu0 %391 }
 0x237   :  { %v395_v12 = vadd.f32 %v394_v10, %v392_v11 }
 0x239   :  { %397 = vst.msk [vmem:[%s601_s7] sm:$0xff] %vm396_vm2, %v395_v12 }
 0x23a   :  { %402 = vsyncpa [#allocation4], 1 }

</bundles_post_ra>
